<compile_context>
chip_gen: v5e
topology: v5e:2x2
jax: 0.10.0
libtpu: 0.0.40
codegen_flags: <defaults>
</compile_context>

<pallas_src>
import jax
import jax.numpy as jnp
from jax.experimental import pallas as pl
from jax.experimental.pallas import tpu as pltpu

_LANES = 128
_MAX_TILE_ROWS = 1024            # 5 streams x 2 bufs x 1024x128 f32 ~= 5 MiB VMEM
_HALF_LOG_2PI = 0.9189385332046727
_VMEM_LIMIT = 32 * 1024 * 1024   # ~6 MiB actually used; cap safe on v5e/v6e/v7x


def _layout(n_elem):
    """Lane-dense layout: rows of 128 lanes; blocks as large as possible while
    still giving >= 2 grid steps when the data allows (v7x second TensorCore);
    the row count is NOT rounded up to a block multiple (ragged last block is
    handled by Pallas' partial-block DMA + an in-kernel element mask)."""
    rows = -(-n_elem // _LANES)
    rows_arr = max(rows, 8)                      # sublane minimum for block shape
    if rows_arr >= 2 * _MAX_TILE_ROWS:
        tile_rows = _MAX_TILE_ROWS
    else:
        tile_rows = max(8, ((-(-rows_arr // 2)) + 7) // 8 * 8)   # ~2 blocks
    num_blocks = -(-rows_arr // tile_rows)
    return rows_arr, tile_rows, num_blocks


def _pack(arr, n_elem, rows_arr):
    """(B, P) -> lane-dense (rows_arr, 128) view in the input's native dtype.
    A pure (free) reshape when B*P is a multiple of 128 and >= 1024."""
    flat = jnp.ravel(arr)
    pad = rows_arr * _LANES - n_elem
    if pad:
        # TODO(synk): pad the batch upstream so B*P % 128 == 0; then this branch
        # never runs and packing is a pure metadata reshape (no HBM copy).
        flat = jnp.pad(flat, (0, pad))
    return flat.reshape(rows_arr, _LANES)


def _make_nb_kernel(n_valid, tile_rows, needs_mask):
    """Kernel for reconst = -NegativeBinomialMixture(mu1, mu2, theta, pi).log_prob(x),
    summed per block into a lane-dense (1, 1, 128) partial-sum output."""

    def kernel(x_ref, mu1_ref, mu2_ref, theta_ref, pi_ref, out_ref):
        f32 = jnp.float32
        eps = f32(1e-8)
        x = x_ref[...].astype(f32)
        mu1 = mu1_ref[...].astype(f32)
        mu2 = mu2_ref[...].astype(f32)
        theta = theta_ref[...].astype(f32)
        pi = pi_ref[...].astype(f32)

        # ---- shared = lgamma(x+theta) - lgamma(theta) - lgamma(x+1) --------
        # Unconditional shift-by-8 Stirling; the three shift corrections are
        # merged into ONE log of a product ratio (4 logs + 1 divide total).
        def stirling0(w):  # lgamma(w) - 0.5*log(2*pi), valid for w >= 8
            r = pl.reciprocal(w, approx=True)      # only feeds the tiny series
            r2 = r * r
            series = r * (f32(1.0 / 12.0)
                          + r2 * (f32(-1.0 / 360.0) + r2 * f32(1.0 / 1260.0)))
            return (w - 0.5) * jnp.log(w) - w + series

        def prod8(z):
            return (z * (z + 1.0) * (z + 2.0) * (z + 3.0)
                    * (z + 4.0) * (z + 5.0) * (z + 6.0) * (z + 7.0))

        xt = x + theta
        st = (stirling0(xt + 8.0) - stirling0(theta + 8.0) - stirling0(x + 9.0)
              - f32(_HALF_LOG_2PI))
        # grouping keeps the intermediate products small for realistic counts
        # (valid for x, theta up to ~6e4; typical ADT counts are << that)
        ratio = (prod8(theta) / prod8(xt)) * prod8(x + 1.0)
        shared = st + jnp.log(ratio)

        # ---- NegativeBinomialMixture.log_prob (scvi log_mixture_nb) --------
        log_theta_eps = jnp.log(theta + eps)
        log_theta_mu1 = jnp.log(theta + mu1 + eps)
        log_theta_mu2 = jnp.log(theta + mu2 + eps)
        log_nb_1 = (theta * (log_theta_eps - log_theta_mu1)
                    + x * (jnp.log(mu1 + eps) - log_theta_mu1) + shared)
        log_nb_2 = (theta * (log_theta_eps - log_theta_mu2)
                    + x * (jnp.log(mu2 + eps) - log_theta_mu2) + shared)

        a = log_nb_1
        b = log_nb_2 - pi
        m = jnp.maximum(a, b)
        lse = m + jnp.log(1.0 + jnp.exp(-jnp.abs(a - b)))            # 1-exp logsumexp
        softplus_neg_pi = jnp.maximum(-pi, 0.0) + jnp.log(1.0 + jnp.exp(-jnp.abs(pi)))
        reconst = softplus_neg_pi - lse                               # = -log_prob

        if needs_mask:
            # Mask flat-pad tail and any garbage rows of a partial last block.
            rows, lanes = x.shape
            base = pl.program_id(0) * tile_rows
            row = jax.lax.broadcasted_iota(jnp.int32, (rows, lanes), 0)
            lane = jax.lax.broadcasted_iota(jnp.int32, (rows, lanes), 1)
            idx = (base + row) * lanes + lane
            reconst = jnp.where(idx < n_valid, reconst, 0.0)

        out_ref[...] = jnp.sum(reconst, axis=0, keepdims=True).reshape(1, 1, _LANES)

    return kernel


def pallas_reconstruction_loss(prior_alpha, prior_beta, qz_loc, qz_scale,
                               rate_back, rate_fore, r, mixing,
                               back_alpha, back_beta, targets, kl_weight=1.0):
    f32 = jnp.float32
    B, P = targets.shape
    # PyTorch broadcast of kl_div_z (B,) onto (B, P) aligns trailing dims, so the
    # original module only works when B == n_proteins.  Keep that quirk.
    assert B == P, "PyTorch broadcast of kl_div_z (B,) onto (B, P) needs B == n_proteins"

    # ---------- protein NB-mixture term: lane-dense Pallas pass over B*P -----
    n_elem = B * P
    rows_arr, tile_rows, num_blocks = _layout(n_elem)
    needs_mask = (n_elem != num_blocks * tile_rows * _LANES)

    packed = [_pack(a, n_elem, rows_arr)
              for a in (targets, rate_back, rate_fore, r, mixing)]

    in_spec = pl.BlockSpec((tile_rows, _LANES), lambda i: (i, 0))
    out_spec = pl.BlockSpec((1, 1, _LANES), lambda i: (i, 0, 0))

    reconst_parts = pl.pallas_call(
        _make_nb_kernel(n_elem, tile_rows, needs_mask),
        grid=(num_blocks,),
        in_specs=[in_spec] * len(packed),
        out_specs=out_spec,
        out_shape=jax.ShapeDtypeStruct((num_blocks, 1, _LANES), f32),
        compiler_params=pltpu.CompilerParams(
            dimension_semantics=("parallel",),
            vmem_limit_bytes=_VMEM_LIMIT),
    )(*packed)
    sum_reconst = jnp.sum(reconst_parts)

    # ---------- KL terms: cheap elementwise+reduce, fused XLA (per review) ----
    # kl(Normal(back_alpha, back_beta), Normal(prior_alpha, prior_beta))
    inv_pb = 1.0 / prior_beta.astype(f32)
    vr = jnp.square(back_beta.astype(f32) * inv_pb[None, :])
    t1 = jnp.square((back_alpha.astype(f32) - prior_alpha.astype(f32)[None, :])
                    * inv_pb[None, :])
    sum_kl_back = 0.5 * jnp.sum(vr + t1 - 1.0 - jnp.log(vr))

    # kl(Normal(qz_loc, qz_scale), Normal(0, 1)).sum()
    var = jnp.square(qz_scale.astype(f32))
    sum_kl_z = 0.5 * jnp.sum(var + jnp.square(qz_loc.astype(f32)) - 1.0 - jnp.log(var))

    # mean over the (B, P) elements; kl_div_z's row-independent broadcast
    # contributes exactly kl_weight * sum(kl_div_z) / B (B == P quirk, see top).
    loss = ((sum_reconst + kl_weight * sum_kl_back) / f32(n_elem)
            + kl_weight * sum_kl_z / f32(B))
    return loss


def _ref_loss(prior_alpha, prior_beta, qz_loc, qz_scale, rate_back, rate_fore,
              r, mixing, back_alpha, back_beta, targets, kl_weight=1.0):
    """Pure-JAX reference, written exactly in the PyTorch module's order."""
    eps = 1e-8
    var_ratio = qz_scale ** 2
    kl_div_z = (0.5 * (var_ratio + qz_loc ** 2 - 1.0 - jnp.log(var_ratio))).sum(axis=1)
    vr = (back_beta / prior_beta[None, :]) ** 2
    t1 = ((back_alpha - prior_alpha[None, :]) / prior_beta[None, :]) ** 2
    kl_back = 0.5 * (vr + t1 - 1.0 - jnp.log(vr))
    theta = r
    ltm1 = jnp.log(theta + rate_back + eps)
    ltm2 = jnp.log(theta + rate_fore + eps)
    lg_xt = jax.lax.lgamma(targets + theta)
    lg_t = jax.lax.lgamma(theta)
    lg_x1 = jax.lax.lgamma(targets + 1.0)
    lnb1 = (theta * (jnp.log(theta + eps) - ltm1)
            + targets * (jnp.log(rate_back + eps) - ltm1) + lg_xt - lg_t - lg_x1)
    lnb2 = (theta * (jnp.log(theta + eps) - ltm2)
            + targets * (jnp.log(rate_fore + eps) - ltm2) + lg_xt - lg_t - lg_x1)
    a, b = lnb1, lnb2 - mixing
    m = jnp.maximum(a, b)
    lse = m + jnp.log(jnp.exp(a - m) + jnp.exp(b - m))
    log_prob = lse - jax.nn.softplus(-mixing)
    reconst = -log_prob
    total = reconst + kl_weight * kl_div_z[None, :] + kl_weight * kl_back
    return jnp.mean(total)


if __name__ == "__main__":
    f32 = jnp.float32

    def make_inputs(key, B, P, L):
        keys = jax.random.split(key, 11)
        # "Module parameters", deterministic in-script.  Prior beta kept strictly
        # positive so Normal(prior) is a valid distribution.
        prior_alpha = jax.random.normal(keys[0], (P,), f32)
        prior_beta = jnp.clip(jnp.abs(jax.random.normal(keys[1], (P,), f32)), 0.1, 1.0)
        # Forward-pass inputs.
        qz_loc = jax.random.normal(keys[2], (B, L), f32)
        qz_scale = jax.nn.softplus(jax.random.normal(keys[3], (B, L), f32)) + 1e-3
        rate_back = jax.nn.softplus(jax.random.normal(keys[4], (B, P), f32)) + 1e-3
        rate_fore = rate_back * (1.0 + jax.nn.softplus(jax.random.normal(keys[5], (B, P), f32)))
        r = jax.nn.softplus(jax.random.normal(keys[6], (B, P), f32)) + 1e-3
        mixing = jax.random.normal(keys[7], (B, P), f32)
        back_alpha = jax.random.normal(keys[8], (B, P), f32)
        back_beta = jax.nn.softplus(jax.random.normal(keys[9], (B, P), f32)) + 1e-3
        targets = jnp.floor(10.0 * jax.random.uniform(keys[10], (B, P), dtype=f32))
        return (prior_alpha, prior_beta, qz_loc, qz_scale, rate_back, rate_fore,
                r, mixing, back_alpha, back_beta, targets)

    loss_fn = jax.jit(pallas_reconstruction_loss)
    key = jax.random.PRNGKey(0)

    # Config 1: aligned path (B*P % 128 == 0, 2 grid blocks, no mask/pad).
    # Config 2: small ragged path (B*P = 100 -> in-kernel element mask).
    configs = [(64, 64, 32), (10, 10, 7)]
    for i, (B, P, L) in enumerate(configs):
        args = make_inputs(jax.random.fold_in(key, i), B, P, L)
        loss = jax.block_until_ready(loss_fn(*args))
        ref = _ref_loss(*args)
        assert bool(jnp.isfinite(loss)), f"non-finite loss for config {(B, P, L)}"
        assert float(jnp.abs(loss - ref)) <= 1e-3 + 1e-3 * float(jnp.abs(ref)), (
            f"mismatch at {(B, P, L)}: pallas={float(loss)} ref={float(ref)}")

    print("KERNEL_OK")
</pallas_src>

<mosaic_0001>
module attributes {stable_mosaic.version = 11 : i64} {
  func.func @kernel(%arg0: i32, %arg1: memref<16x128xf32, #tpu.memory_space<vmem>>, %arg2: memref<16x128xf32, #tpu.memory_space<vmem>>, %arg3: memref<16x128xf32, #tpu.memory_space<vmem>>, %arg4: memref<16x128xf32, #tpu.memory_space<vmem>>, %arg5: memref<16x128xf32, #tpu.memory_space<vmem>>, %arg6: memref<1x1x128xf32, #tpu.memory_space<vmem>>) attributes {dimension_semantics = [#tpu.dimension_semantics<parallel>], iteration_bounds = array<i64: 2>, scalar_prefetch = 0 : i64, scratch_operands = 0 : i64, tpu.core_type = #tpu.core_type<tc>, window_params = [{transform_indices = @transform_0, window_bounds = array<i64: 16, 128>}, {transform_indices = @transform_1, window_bounds = array<i64: 16, 128>}, {transform_indices = @transform_2, window_bounds = array<i64: 16, 128>}, {transform_indices = @transform_3, window_bounds = array<i64: 16, 128>}, {transform_indices = @transform_4, window_bounds = array<i64: 16, 128>}, {transform_indices = @transform_5, window_bounds = array<i64: 1, 1, 128>}]} {
    %c0 = arith.constant 0 : index
    %c0_0 = arith.constant 0 : index
    %0 = vector.load %arg1[%c0, %c0_0] : memref<16x128xf32, #tpu.memory_space<vmem>>, vector<16x128xf32>
    %c0_1 = arith.constant 0 : index
    %c0_2 = arith.constant 0 : index
    %1 = vector.load %arg2[%c0_1, %c0_2] : memref<16x128xf32, #tpu.memory_space<vmem>>, vector<16x128xf32>
    %c0_3 = arith.constant 0 : index
    %c0_4 = arith.constant 0 : index
    %2 = vector.load %arg3[%c0_3, %c0_4] : memref<16x128xf32, #tpu.memory_space<vmem>>, vector<16x128xf32>
    %c0_5 = arith.constant 0 : index
    %c0_6 = arith.constant 0 : index
    %3 = vector.load %arg4[%c0_5, %c0_6] : memref<16x128xf32, #tpu.memory_space<vmem>>, vector<16x128xf32>
    %c0_7 = arith.constant 0 : index
    %c0_8 = arith.constant 0 : index
    %4 = vector.load %arg5[%c0_7, %c0_8] : memref<16x128xf32, #tpu.memory_space<vmem>>, vector<16x128xf32>
    %5 = arith.addf %0, %3 : vector<16x128xf32>
    %cst = arith.constant 8.000000e+00 : f32
    %6 = vector.broadcast %cst : f32 to vector<16x128xf32>
    %7 = arith.addf %5, %6 : vector<16x128xf32>
    %8 = tpu.reciprocal %7 {approx = true} : vector<16x128xf32> -> vector<16x128xf32>
    %9 = arith.mulf %8, %8 : vector<16x128xf32>
    %cst_9 = arith.constant 7.93650805E-4 : f32
    %10 = vector.broadcast %cst_9 : f32 to vector<16x128xf32>
    %11 = arith.mulf %9, %10 : vector<16x128xf32>
    %cst_10 = arith.constant -0.00277777785 : f32
    %12 = vector.broadcast %cst_10 : f32 to vector<16x128xf32>
    %13 = arith.addf %12, %11 : vector<16x128xf32>
    %14 = arith.mulf %9, %13 : vector<16x128xf32>
    %cst_11 = arith.constant 0.0833333358 : f32
    %15 = vector.broadcast %cst_11 : f32 to vector<16x128xf32>
    %16 = arith.addf %15, %14 : vector<16x128xf32>
    %17 = arith.mulf %8, %16 : vector<16x128xf32>
    %cst_12 = arith.constant 5.000000e-01 : f32
    %18 = vector.broadcast %cst_12 : f32 to vector<16x128xf32>
    %19 = arith.subf %7, %18 : vector<16x128xf32>
    %20 = math.log %7 : vector<16x128xf32>
    %21 = arith.mulf %19, %20 : vector<16x128xf32>
    %22 = arith.subf %21, %7 : vector<16x128xf32>
    %23 = arith.addf %22, %17 : vector<16x128xf32>
    %cst_13 = arith.constant 8.000000e+00 : f32
    %24 = vector.broadcast %cst_13 : f32 to vector<16x128xf32>
    %25 = arith.addf %3, %24 : vector<16x128xf32>
    %26 = tpu.reciprocal %25 {approx = true} : vector<16x128xf32> -> vector<16x128xf32>
    %27 = arith.mulf %26, %26 : vector<16x128xf32>
    %cst_14 = arith.constant 7.93650805E-4 : f32
    %28 = vector.broadcast %cst_14 : f32 to vector<16x128xf32>
    %29 = arith.mulf %27, %28 : vector<16x128xf32>
    %cst_15 = arith.constant -0.00277777785 : f32
    %30 = vector.broadcast %cst_15 : f32 to vector<16x128xf32>
    %31 = arith.addf %30, %29 : vector<16x128xf32>
    %32 = arith.mulf %27, %31 : vector<16x128xf32>
    %cst_16 = arith.constant 0.0833333358 : f32
    %33 = vector.broadcast %cst_16 : f32 to vector<16x128xf32>
    %34 = arith.addf %33, %32 : vector<16x128xf32>
    %35 = arith.mulf %26, %34 : vector<16x128xf32>
    %cst_17 = arith.constant 5.000000e-01 : f32
    %36 = vector.broadcast %cst_17 : f32 to vector<16x128xf32>
    %37 = arith.subf %25, %36 : vector<16x128xf32>
    %38 = math.log %25 : vector<16x128xf32>
    %39 = arith.mulf %37, %38 : vector<16x128xf32>
    %40 = arith.subf %39, %25 : vector<16x128xf32>
    %41 = arith.addf %40, %35 : vector<16x128xf32>
    %42 = arith.subf %23, %41 : vector<16x128xf32>
    %cst_18 = arith.constant 9.000000e+00 : f32
    %43 = vector.broadcast %cst_18 : f32 to vector<16x128xf32>
    %44 = arith.addf %0, %43 : vector<16x128xf32>
    %45 = tpu.reciprocal %44 {approx = true} : vector<16x128xf32> -> vector<16x128xf32>
    %46 = arith.mulf %45, %45 : vector<16x128xf32>
    %cst_19 = arith.constant 7.93650805E-4 : f32
    %47 = vector.broadcast %cst_19 : f32 to vector<16x128xf32>
    %48 = arith.mulf %46, %47 : vector<16x128xf32>
    %cst_20 = arith.constant -0.00277777785 : f32
    %49 = vector.broadcast %cst_20 : f32 to vector<16x128xf32>
    %50 = arith.addf %49, %48 : vector<16x128xf32>
    %51 = arith.mulf %46, %50 : vector<16x128xf32>
    %cst_21 = arith.constant 0.0833333358 : f32
    %52 = vector.broadcast %cst_21 : f32 to vector<16x128xf32>
    %53 = arith.addf %52, %51 : vector<16x128xf32>
    %54 = arith.mulf %45, %53 : vector<16x128xf32>
    %cst_22 = arith.constant 5.000000e-01 : f32
    %55 = vector.broadcast %cst_22 : f32 to vector<16x128xf32>
    %56 = arith.subf %44, %55 : vector<16x128xf32>
    %57 = math.log %44 : vector<16x128xf32>
    %58 = arith.mulf %56, %57 : vector<16x128xf32>
    %59 = arith.subf %58, %44 : vector<16x128xf32>
    %60 = arith.addf %59, %54 : vector<16x128xf32>
    %61 = arith.subf %42, %60 : vector<16x128xf32>
    %cst_23 = arith.constant 0.918938517 : f32
    %62 = vector.broadcast %cst_23 : f32 to vector<16x128xf32>
    %63 = arith.subf %61, %62 : vector<16x128xf32>
    %cst_24 = arith.constant 1.000000e+00 : f32
    %64 = vector.broadcast %cst_24 : f32 to vector<16x128xf32>
    %65 = arith.addf %3, %64 : vector<16x128xf32>
    %66 = arith.mulf %3, %65 : vector<16x128xf32>
    %cst_25 = arith.constant 2.000000e+00 : f32
    %67 = vector.broadcast %cst_25 : f32 to vector<16x128xf32>
    %68 = arith.addf %3, %67 : vector<16x128xf32>
    %69 = arith.mulf %66, %68 : vector<16x128xf32>
    %cst_26 = arith.constant 3.000000e+00 : f32
    %70 = vector.broadcast %cst_26 : f32 to vector<16x128xf32>
    %71 = arith.addf %3, %70 : vector<16x128xf32>
    %72 = arith.mulf %69, %71 : vector<16x128xf32>
    %cst_27 = arith.constant 4.000000e+00 : f32
    %73 = vector.broadcast %cst_27 : f32 to vector<16x128xf32>
    %74 = arith.addf %3, %73 : vector<16x128xf32>
    %75 = arith.mulf %72, %74 : vector<16x128xf32>
    %cst_28 = arith.constant 5.000000e+00 : f32
    %76 = vector.broadcast %cst_28 : f32 to vector<16x128xf32>
    %77 = arith.addf %3, %76 : vector<16x128xf32>
    %78 = arith.mulf %75, %77 : vector<16x128xf32>
    %cst_29 = arith.constant 6.000000e+00 : f32
    %79 = vector.broadcast %cst_29 : f32 to vector<16x128xf32>
    %80 = arith.addf %3, %79 : vector<16x128xf32>
    %81 = arith.mulf %78, %80 : vector<16x128xf32>
    %cst_30 = arith.constant 7.000000e+00 : f32
    %82 = vector.broadcast %cst_30 : f32 to vector<16x128xf32>
    %83 = arith.addf %3, %82 : vector<16x128xf32>
    %84 = arith.mulf %81, %83 : vector<16x128xf32>
    %cst_31 = arith.constant 1.000000e+00 : f32
    %85 = vector.broadcast %cst_31 : f32 to vector<16x128xf32>
    %86 = arith.addf %5, %85 : vector<16x128xf32>
    %87 = arith.mulf %5, %86 : vector<16x128xf32>
    %cst_32 = arith.constant 2.000000e+00 : f32
    %88 = vector.broadcast %cst_32 : f32 to vector<16x128xf32>
    %89 = arith.addf %5, %88 : vector<16x128xf32>
    %90 = arith.mulf %87, %89 : vector<16x128xf32>
    %cst_33 = arith.constant 3.000000e+00 : f32
    %91 = vector.broadcast %cst_33 : f32 to vector<16x128xf32>
    %92 = arith.addf %5, %91 : vector<16x128xf32>
    %93 = arith.mulf %90, %92 : vector<16x128xf32>
    %cst_34 = arith.constant 4.000000e+00 : f32
    %94 = vector.broadcast %cst_34 : f32 to vector<16x128xf32>
    %95 = arith.addf %5, %94 : vector<16x128xf32>
    %96 = arith.mulf %93, %95 : vector<16x128xf32>
    %cst_35 = arith.constant 5.000000e+00 : f32
    %97 = vector.broadcast %cst_35 : f32 to vector<16x128xf32>
    %98 = arith.addf %5, %97 : vector<16x128xf32>
    %99 = arith.mulf %96, %98 : vector<16x128xf32>
    %cst_36 = arith.constant 6.000000e+00 : f32
    %100 = vector.broadcast %cst_36 : f32 to vector<16x128xf32>
    %101 = arith.addf %5, %100 : vector<16x128xf32>
    %102 = arith.mulf %99, %101 : vector<16x128xf32>
    %cst_37 = arith.constant 7.000000e+00 : f32
    %103 = vector.broadcast %cst_37 : f32 to vector<16x128xf32>
    %104 = arith.addf %5, %103 : vector<16x128xf32>
    %105 = arith.mulf %102, %104 : vector<16x128xf32>
    %106 = arith.divf %84, %105 : vector<16x128xf32>
    %cst_38 = arith.constant 1.000000e+00 : f32
    %107 = vector.broadcast %cst_38 : f32 to vector<16x128xf32>
    %108 = arith.addf %0, %107 : vector<16x128xf32>
    %cst_39 = arith.constant 1.000000e+00 : f32
    %109 = vector.broadcast %cst_39 : f32 to vector<16x128xf32>
    %110 = arith.addf %108, %109 : vector<16x128xf32>
    %111 = arith.mulf %108, %110 : vector<16x128xf32>
    %cst_40 = arith.constant 2.000000e+00 : f32
    %112 = vector.broadcast %cst_40 : f32 to vector<16x128xf32>
    %113 = arith.addf %108, %112 : vector<16x128xf32>
    %114 = arith.mulf %111, %113 : vector<16x128xf32>
    %cst_41 = arith.constant 3.000000e+00 : f32
    %115 = vector.broadcast %cst_41 : f32 to vector<16x128xf32>
    %116 = arith.addf %108, %115 : vector<16x128xf32>
    %117 = arith.mulf %114, %116 : vector<16x128xf32>
    %cst_42 = arith.constant 4.000000e+00 : f32
    %118 = vector.broadcast %cst_42 : f32 to vector<16x128xf32>
    %119 = arith.addf %108, %118 : vector<16x128xf32>
    %120 = arith.mulf %117, %119 : vector<16x128xf32>
    %cst_43 = arith.constant 5.000000e+00 : f32
    %121 = vector.broadcast %cst_43 : f32 to vector<16x128xf32>
    %122 = arith.addf %108, %121 : vector<16x128xf32>
    %123 = arith.mulf %120, %122 : vector<16x128xf32>
    %cst_44 = arith.constant 6.000000e+00 : f32
    %124 = vector.broadcast %cst_44 : f32 to vector<16x128xf32>
    %125 = arith.addf %108, %124 : vector<16x128xf32>
    %126 = arith.mulf %123, %125 : vector<16x128xf32>
    %cst_45 = arith.constant 7.000000e+00 : f32
    %127 = vector.broadcast %cst_45 : f32 to vector<16x128xf32>
    %128 = arith.addf %108, %127 : vector<16x128xf32>
    %129 = arith.mulf %126, %128 : vector<16x128xf32>
    %130 = arith.mulf %106, %129 : vector<16x128xf32>
    %131 = math.log %130 : vector<16x128xf32>
    %132 = arith.addf %63, %131 : vector<16x128xf32>
    %cst_46 = arith.constant 9.99999993E-9 : f32
    %133 = vector.broadcast %cst_46 : f32 to vector<16x128xf32>
    %134 = arith.addf %3, %133 : vector<16x128xf32>
    %135 = math.log %134 : vector<16x128xf32>
    %136 = arith.addf %3, %1 : vector<16x128xf32>
    %cst_47 = arith.constant 9.99999993E-9 : f32
    %137 = vector.broadcast %cst_47 : f32 to vector<16x128xf32>
    %138 = arith.addf %136, %137 : vector<16x128xf32>
    %139 = math.log %138 : vector<16x128xf32>
    %140 = arith.addf %3, %2 : vector<16x128xf32>
    %cst_48 = arith.constant 9.99999993E-9 : f32
    %141 = vector.broadcast %cst_48 : f32 to vector<16x128xf32>
    %142 = arith.addf %140, %141 : vector<16x128xf32>
    %143 = math.log %142 : vector<16x128xf32>
    %144 = arith.subf %135, %139 : vector<16x128xf32>
    %145 = arith.mulf %3, %144 : vector<16x128xf32>
    %cst_49 = arith.constant 9.99999993E-9 : f32
    %146 = vector.broadcast %cst_49 : f32 to vector<16x128xf32>
    %147 = arith.addf %1, %146 : vector<16x128xf32>
    %148 = math.log %147 : vector<16x128xf32>
    %149 = arith.subf %148, %139 : vector<16x128xf32>
    %150 = arith.mulf %0, %149 : vector<16x128xf32>
    %151 = arith.addf %145, %150 : vector<16x128xf32>
    %152 = arith.addf %151, %132 : vector<16x128xf32>
    %153 = arith.subf %135, %143 : vector<16x128xf32>
    %154 = arith.mulf %3, %153 : vector<16x128xf32>
    %cst_50 = arith.constant 9.99999993E-9 : f32
    %155 = vector.broadcast %cst_50 : f32 to vector<16x128xf32>
    %156 = arith.addf %2, %155 : vector<16x128xf32>
    %157 = math.log %156 : vector<16x128xf32>
    %158 = arith.subf %157, %143 : vector<16x128xf32>
    %159 = arith.mulf %0, %158 : vector<16x128xf32>
    %160 = arith.addf %154, %159 : vector<16x128xf32>
    %161 = arith.addf %160, %132 : vector<16x128xf32>
    %162 = arith.subf %161, %4 : vector<16x128xf32>
    %163 = arith.maximumf %152, %162 : vector<16x128xf32>
    %164 = arith.subf %152, %162 : vector<16x128xf32>
    %165 = math.absf %164 : vector<16x128xf32>
    %cst_51 = arith.constant 0.000000e+00 : f32
    %166 = vector.broadcast %cst_51 : f32 to vector<16x128xf32>
    %167 = arith.subf %166, %165 : vector<16x128xf32>
    %168 = math.exp %167 : vector<16x128xf32>
    %cst_52 = arith.constant 1.000000e+00 : f32
    %169 = vector.broadcast %cst_52 : f32 to vector<16x128xf32>
    %170 = arith.addf %169, %168 : vector<16x128xf32>
    %171 = math.log %170 : vector<16x128xf32>
    %172 = arith.addf %163, %171 : vector<16x128xf32>
    %cst_53 = arith.constant 0.000000e+00 : f32
    %173 = vector.broadcast %cst_53 : f32 to vector<16x128xf32>
    %174 = arith.subf %173, %4 : vector<16x128xf32>
    %cst_54 = arith.constant 0.000000e+00 : f32
    %175 = vector.broadcast %cst_54 : f32 to vector<16x128xf32>
    %176 = arith.maximumf %174, %175 : vector<16x128xf32>
    %177 = math.absf %4 : vector<16x128xf32>
    %cst_55 = arith.constant 0.000000e+00 : f32
    %178 = vector.broadcast %cst_55 : f32 to vector<16x128xf32>
    %179 = arith.subf %178, %177 : vector<16x128xf32>
    %180 = math.exp %179 : vector<16x128xf32>
    %cst_56 = arith.constant 1.000000e+00 : f32
    %181 = vector.broadcast %cst_56 : f32 to vector<16x128xf32>
    %182 = arith.addf %181, %180 : vector<16x128xf32>
    %183 = math.log %182 : vector<16x128xf32>
    %184 = arith.addf %176, %183 : vector<16x128xf32>
    %185 = arith.subf %184, %172 : vector<16x128xf32>
    %cst_57 = arith.constant dense<0.000000e+00> : vector<128xf32>
    %186 = vector.multi_reduction <add>, %185, %cst_57 [0] : vector<16x128xf32> to vector<128xf32>
    %187 = vector.shape_cast %186 : vector<128xf32> to vector<1x128xf32>
    %188 = vector.shape_cast %187 : vector<1x128xf32> to vector<1x1x128xf32>
    %c0_58 = arith.constant 0 : index
    %c0_59 = arith.constant 0 : index
    %c0_60 = arith.constant 0 : index
    %189 = vector.load %arg6[%c0_58, %c0_59, %c0_60] : memref<1x1x128xf32, #tpu.memory_space<vmem>>, vector<1x1x128xf32>
    tpu.vector_store %arg6[%c0_58, %c0_59, %c0_60], %188 {strides = array<i32>} : memref<1x1x128xf32, #tpu.memory_space<vmem>>, vector<1x1x128xf32>,
    return
  }
  func.func @transform_0(%arg0: i32) -> (i32, i32) {
    %c0_i32 = arith.constant 0 : i32
    %c0_i32_0 = arith.constant 0 : i32
    return %arg0, %c0_i32 : i32, i32
  }
  func.func @transform_1(%arg0: i32) -> (i32, i32) {
    %c0_i32 = arith.constant 0 : i32
    %c0_i32_0 = arith.constant 0 : i32
    return %arg0, %c0_i32 : i32, i32
  }
  func.func @transform_2(%arg0: i32) -> (i32, i32) {
    %c0_i32 = arith.constant 0 : i32
    %c0_i32_0 = arith.constant 0 : i32
    return %arg0, %c0_i32 : i32, i32
  }
  func.func @transform_3(%arg0: i32) -> (i32, i32) {
    %c0_i32 = arith.constant 0 : i32
    %c0_i32_0 = arith.constant 0 : i32
    return %arg0, %c0_i32 : i32, i32
  }
  func.func @transform_4(%arg0: i32) -> (i32, i32) {
    %c0_i32 = arith.constant 0 : i32
    %c0_i32_0 = arith.constant 0 : i32
    return %arg0, %c0_i32 : i32, i32
  }
  func.func @transform_5(%arg0: i32) -> (i32, i32, i32) {
    %c0_i32 = arith.constant 0 : i32
    %c0_i32_0 = arith.constant 0 : i32
    %c0_i32_1 = arith.constant 0 : i32
    return %arg0, %c0_i32, %c0_i32_0 : i32, i32, i32
  }
}

</mosaic_0001>

<bundles_post_ra>
// kernel: pallas_reconstruction_loss.1
= control target key start
LH: loop header
LB: loop body
LE: loop exit
PB: predicated region body
PF: predicated region fallthrough
CT: control target
= control target key end

     0   :  { %s881_s18 = smov 0   ;;  %s1137_s0 = inlined_call_operand.vmem [shape: f32[32,128], index: 0, kind: input, shape index: {}]   ;;  %s1138_s1 = inlined_call_operand.vmem [shape: f32[32,128], index: 1, kind: input, shape index: {}]   ;;  %s1139_s2 = inlined_call_operand.vmem [shape: f32[32,128], index: 2, kind: input, shape index: {}]   ;;  %s1140_s3 = inlined_call_operand.vmem [shape: f32[32,128], index: 3, kind: input, shape index: {}]   ;;  %s1141_s4 = inlined_call_operand.vmem [shape: f32[32,128], index: 4, kind: input, shape index: {}]   ;;  %s1142_s5 = inlined_call_operand.vmem [shape: f32[2,1,128], index: 5, kind: output, shape index: {}]  }
   0x1 LB: > { %s887_s19 = sadd.s32 4294967295, %s849_s18   ;;  %p746_p0 = scmp.ge.s32.totalorder %s849_s18, 1  ;;  %s849_s18 = sphi %s881_s18, %s15_s18  }
   0x2   : > { %p232_p1 = scmp.lt.s32.totalorder %s849_s18, 3 }
   0x4   : > { %p233_p2 = pnand %p746_p0, %p232_p1 }
   0x5   : > { %s747_s20 = sshll.u32 (!%p233_p2), %s887_s19, 1  ;;  %p308_p4 = scmp.lt.s32.totalorder (!%p233_p2), %s887_s19, 1 }
   0x6   : > { %236 = sbr.rel (%p233_p2) target bundleno = 139 (0x8b), region = 40  ;;  %p279_p3 = scmp.lt.s32.totalorder (!%p233_p2), %s747_s20, 3 }
   0xb   : > { %s1148_s20 = smov (!%p279_p3, %s747_s20), 3  ;;  %s1150_s19 = smov (!%p308_p4, %s887_s19), 1 }
   0xc   : > { %s892_s21 = sshll.u32 %s1148_s20, 3  ;;  %s310_s14 = scalar_lea.vmem %s1142_s5, %s1150_s19 }
   0xd   : > { %s282_s24 = scalar_lea.vmem %s1137_s0, %s892_s21  ;;  %s300_s27 = scalar_lea.vmem %s1140_s3, %s892_s21 }
   0xe   : > { %v902_v0 = vld [vmem:[%s282_s24] sm:$0xff]  ;;  %v904_v1 = vld [vmem:[%s282_s24 + $0x8] sm:$0xff]  ;;  %s288_s30 = scalar_lea.vmem %s1138_s1, %s892_s21  ;;  %s294_s8 = scalar_lea.vmem %s1139_s2, %s892_s21 }
   0xf   : > { %v907_v2 = vadd.f32 9.0, %v902_v0  ;;  %v909_v3 = vld [vmem:[%s300_s27] sm:$0xff]  ;;  %v911_v4 = vld [vmem:[%s300_s27 + $0x8] sm:$0xff]  ;;  %v942_v13 = vadd.f32 9.0, %v904_v1  ;;  %s306_s11 = scalar_lea.vmem %s1141_s4, %s892_s21 }
  0x10   : > { %v915_v5 = vadd.f32 %v909_v3, %v902_v0  ;;  %v919_v6 = vadd.f32 %v911_v4, %v904_v1  ;;  %v922_v7 = vadd.f32 8.0, %v909_v3  ;;  %v925_v8 = vadd.f32 8.0, %v911_v4 }
  0x11   : > { %775 = vrcp.f32 %v907_v2  ;;  %v413_v11 = vadd.f32 1.0, %v909_v3  ;;  %v414_v12 = vadd.f32 1.0, %v911_v4  ;;  %v417_v20 = vadd.f32 2.0, %v909_v3 }
  0x12   : > { %v929_v9 = vadd.f32 8.0, %v915_v5  ;;  %v932_v10 = vadd.f32 8.0, %v919_v6  ;;  %777 = vrcp.f32 %v922_v7  ;;  %v759_v15 = vadd.f32 -0.5, %v922_v7 }
  0x13   : > { %779 = vrcp.f32 %v925_v8  ;;  %v760_v16 = vadd.f32 -0.5, %v925_v8  ;;  %v415_v19 = vmul.f32 %v413_v11, %v909_v3  ;;  %v416_v23 = vmul.f32 %v414_v12, %v911_v4 }
  0x14   : > { %781 = vrcp.f32 %v929_v9  ;;  %v418_v24 = vadd.f32 2.0, %v911_v4  ;;  %v757_v26 = vadd.f32 -0.5, %v929_v9  ;;  %v758_v31 = vadd.f32 -0.5, %v932_v10 }
  0x15   : > { %783 = vrcp.f32 %v932_v10  ;;  %v421_v33 = vadd.f32 3.0, %v909_v3  ;;  %v419_v37 = vmul.f32 %v417_v20, %v415_v19  ;;  %v422_v38 = vadd.f32 3.0, %v911_v4 }
  0x16   : > { %785 = vlog2.f32 %v929_v9  ;;  %v420_v42 = vmul.f32 %v418_v24, %v416_v23  ;;  %v425_v43 = vadd.f32 4.0, %v909_v3  ;;  %v426_v24 = vadd.f32 4.0, %v911_v4 }
  0x17   : > { %v944_v14 = vpop.eup %775  ;;  %787 = vlog2.f32 %v932_v10  ;;  %v423_v57 = vmul.f32 %v421_v33, %v419_v37 }
  0x18   : > { %v778_v17 = vpop.eup %777  ;;  %789 = vlog2.f32 %v922_v7  ;;  %v385_v18 = vmul.f32 %v944_v14, %v944_v14 }
  0x19   : > { %v780_v21 = vpop.eup %779  ;;  %v355_v22 = vmul.f32 %v778_v17, %v778_v17  ;;  %791 = vlog2.f32 %v925_v8  ;;  %v427_v33 = vmul.f32 %v425_v43, %v423_v57  ;;  %v450_v57 = vadd.f32 3.0, %v919_v6 }
  0x1a   : > { %v782_v25 = vpop.eup %781  ;;  %v356_v27 = vmul.f32 %v780_v21, %v780_v21  ;;  %793 = vrcp.f32 %v942_v13  ;;  %v387_v28 = vmul.f32 0.0007936508, %v385_v18 }
  0x1b   : > { %v959_v29 = vpop.eup %783  ;;  %v327_v30 = vmul.f32 %v782_v25, %v782_v25  ;;  %v357_v32 = vmul.f32 0.0007936508, %v355_v22  ;;  %795 = vlog2.f32 %v907_v2 }
  0x1c   : > { %v786_v34 = vpop.eup %785  ;;  %v328_v35 = vmul.f32 %v959_v29, %v959_v29  ;;  %v358_v36 = vmul.f32 0.0007936508, %v356_v27  ;;  %v389_v47 = vadd.f32 -0.0027777778, %v387_v28  ;;  %797 = vlog2.f32 %v942_v13 }
  0x1d   : > { %v788_v39 = vpop.eup %787  ;;  %v329_v40 = vmul.f32 0.0007936508, %v327_v30  ;;  %v359_v41 = vadd.f32 -0.0027777778, %v357_v32  ;;  %v342_v50 = vmul.f32 0.6931472, %v786_v34  ;;  %v424_v32 = vmul.f32 %v422_v38, %v420_v42 }
  0x1e   : > { %v790_v44 = vpop.eup %789  ;;  %v330_v45 = vmul.f32 0.0007936508, %v328_v35  ;;  %v360_v46 = vadd.f32 -0.0027777778, %v358_v36  ;;  %v344_v59 = vmul.f32 0.6931472, %v788_v39 }
  0x1f   : > { %v792_v48 = vpop.eup %791  ;;  %v331_v49 = vadd.f32 -0.0027777778, %v329_v40  ;;  %v361_v51 = vmul.f32 %v359_v41, %v355_v22  ;;  %v370_v52 = vmul.f32 0.6931472, %v790_v44  ;;  %v345_v19 = vmul.f32 %v757_v26, %v342_v50 }
  0x20   : > { %v968_v53 = vpop.eup %793  ;;  %v332_v54 = vadd.f32 -0.0027777778, %v330_v45  ;;  %v362_v55 = vmul.f32 %v360_v46, %v356_v27  ;;  %v372_v56 = vmul.f32 0.6931472, %v792_v48  ;;  %v391_v22 = vmul.f32 %v389_v47, %v385_v18 }
  0x21   : > { %v333_v58 = vmul.f32 %v331_v49, %v327_v30  ;;  %v363_v60 = vadd.f32 0.083333336, %v361_v51  ;;  %v373_v63 = vmul.f32 %v759_v15, %v370_v52  ;;  %v386_v20 = vmul.f32 %v968_v53, %v968_v53  ;;  %v796_v23 = vpop.eup %795 }
  0x22   : > { %v334_v61 = vmul.f32 %v332_v54, %v328_v35  ;;  %v364_v62 = vadd.f32 0.083333336, %v362_v55  ;;  %v374_v11 = vmul.f32 %v760_v16, %v372_v56  ;;  %v429_v27 = vadd.f32 5.0, %v909_v3  ;;  %v798_v26 = vpop.eup %797 }
  0x23   : > { %v335_v12 = vadd.f32 0.083333336, %v333_v58  ;;  %v346_v28 = vmul.f32 %v758_v31, %v344_v59  ;;  %v365_v30 = vmul.f32 %v778_v17, %v363_v60  ;;  %v375_v15 = vsub.f32 %v373_v63, %v922_v7 }
  0x24   : > { %v336_v34 = vadd.f32 0.083333336, %v334_v61  ;;  %v366_v35 = vmul.f32 %v780_v21, %v364_v62  ;;  %v376_v16 = vsub.f32 %v374_v11, %v925_v8  ;;  %v347_v37 = vsub.f32 %v345_v19, %v929_v9 }
  0x25   : > { %v337_v36 = vmul.f32 %v782_v25, %v335_v12  ;;  %v388_v18 = vmul.f32 0.0007936508, %v386_v20  ;;  %v393_v39 = vadd.f32 0.083333336, %v391_v22  ;;  %v761_v40 = vadd.f32 -0.5, %v907_v2 }
  0x26   : > { %v762_v41 = vadd.f32 -0.5, %v942_v13  ;;  %v400_v31 = vmul.f32 0.6931472, %v796_v23  ;;  %v430_v17 = vadd.f32 5.0, %v911_v4  ;;  %v348_v38 = vsub.f32 %v346_v28, %v932_v10 }
  0x27   : > { %v428_v21 = vmul.f32 %v426_v24, %v424_v32  ;;  %v431_v42 = vmul.f32 %v429_v27, %v427_v33  ;;  %v433_v7 = vadd.f32 6.0, %v909_v3  ;;  %v338_v8 = vmul.f32 %v959_v29, %v336_v34 }
  0x28   : > { %v984_v25 = vadd.f32 %v375_v15, %v365_v30  ;;  %v986_v9 = vadd.f32 %v376_v16, %v366_v35  ;;  %v402_v43 = vmul.f32 0.6931472, %v798_v26  ;;  %v988_v44 = vadd.f32 %v347_v37, %v337_v36 }
  0x29   : > { %v390_v45 = vadd.f32 -0.0027777778, %v388_v18  ;;  %v991_v46 = vmul.f32 %v944_v14, %v393_v39  ;;  %v441_v47 = vadd.f32 1.0, %v915_v5  ;;  %v994_v10 = vmul.f32 %v761_v40, %v400_v31 }
  0x2a   : > { %v442_v48 = vadd.f32 1.0, %v919_v6  ;;  %v445_v49 = vadd.f32 2.0, %v915_v5  ;;  %v446_v29 = vadd.f32 2.0, %v919_v6  ;;  %v432_v50 = vmul.f32 %v430_v17, %v428_v21 }
  0x2b   : > { %v434_v51 = vadd.f32 6.0, %v911_v4  ;;  %v443_v52 = vmul.f32 %v441_v47, %v915_v5  ;;  %v449_v54 = vadd.f32 3.0, %v915_v5  ;;  %v1002_v55 = vadd.f32 %v348_v38, %v338_v8 }
  0x2c   : > { %v1004_v14 = vmul.f32 %v762_v41, %v402_v43  ;;  %v444_v56 = vmul.f32 %v442_v48, %v919_v6  ;;  %v392_v58 = vmul.f32 %v390_v45, %v386_v20  ;;  %v435_v59 = vmul.f32 %v433_v7, %v431_v42 }
  0x2d   : > { %v447_v60 = vmul.f32 %v445_v49, %v443_v52  ;;  %v453_v61 = vadd.f32 4.0, %v915_v5  ;;  %v379_v62 = vsub.f32 %v988_v44, %v984_v25  ;;  %v437_v63 = vadd.f32 7.0, %v909_v3 }
  0x2e   : > { %v448_v11 = vmul.f32 %v446_v29, %v444_v56  ;;  %v454_v12 = vadd.f32 4.0, %v919_v6  ;;  %v436_v19 = vmul.f32 %v434_v51, %v432_v50  ;;  %v438_v22 = vadd.f32 7.0, %v911_v4 }
  0x2f   : > { %v451_v23 = vmul.f32 %v449_v54, %v447_v60  ;;  %v457_v24 = vadd.f32 5.0, %v915_v5  ;;  %v458_v27 = vadd.f32 5.0, %v919_v6  ;;  %v499_v28 = vadd.f32 1.0, %v902_v0 }
  0x30   : > { %v452_v20 = vmul.f32 %v450_v57, %v448_v11  ;;  %v1018_v30 = vadd.f32 1.0, %v904_v1  ;;  %v394_v32 = vadd.f32 0.083333336, %v392_v58  ;;  %v461_v34 = vadd.f32 6.0, %v915_v5  ;;  %v314_v57 = vld [vmem:[%s288_s30 + $0x8] sm:$0xff] }
  0x31   : > { %v455_v33 = vmul.f32 %v453_v61, %v451_v23  ;;  %v462_v35 = vadd.f32 6.0, %v919_v6  ;;  %v501_v16 = vadd.f32 1.0, %v499_v28  ;;  %v505_v36 = vadd.f32 2.0, %v499_v28  ;;  %v315_v61 = vld [vmem:[%s294_s8] sm:$0xff] }
  0x32   : > { %v456_v15 = vmul.f32 %v454_v12, %v452_v20  ;;  %v502_v26 = vadd.f32 1.0, %v1018_v30  ;;  %v465_v18 = vadd.f32 7.0, %v915_v5  ;;  %v466_v39 = vadd.f32 7.0, %v919_v6  ;;  %v313_v5 = vld [vmem:[%s288_s30] sm:$0xff]  ;;  %v316_v12 = vld [vmem:[%s294_s8 + $0x8] sm:$0xff] }
  0x33   : > { %v459_v37 = vmul.f32 %v457_v24, %v455_v33  ;;  %v506_v40 = vadd.f32 2.0, %v1018_v30  ;;  %v503_v31 = vmul.f32 %v501_v16, %v499_v28  ;;  %v509_v38 = vadd.f32 3.0, %v499_v28 }
  0x34   : > { %v460_v41 = vmul.f32 %v458_v27, %v456_v15  ;;  %v504_v17 = vmul.f32 %v502_v26, %v1018_v30  ;;  %v380_v21 = vsub.f32 %v1002_v55, %v986_v9  ;;  %v405_v42 = vsub.f32 %v994_v10, %v907_v2  ;;  %v1105_v2 = vld [vmem:[%s306_s11] sm:$0xff] }
  0x35   : > { %v463_v7 = vmul.f32 %v461_v34, %v459_v37  ;;  %v510_v8 = vadd.f32 3.0, %v1018_v30  ;;  %v406_v6 = vsub.f32 %v1004_v14, %v942_v13  ;;  %v507_v45 = vmul.f32 %v505_v36, %v503_v31  ;;  %v1107_v14 = vld [vmem:[%s306_s11 + $0x8] sm:$0xff] }
  0x36   : > { %v464_v43 = vmul.f32 %v462_v35, %v460_v41  ;;  %v508_v47 = vmul.f32 %v506_v40, %v504_v17  ;;  %v1042_v48 = vmul.f32 %v437_v63, %v435_v59  ;;  %v1044_v49 = vmul.f32 %v438_v22, %v436_v19 }
  0x37   : > { %v1046_v29 = vmul.f32 %v465_v18, %v463_v7  ;;  %v537_v50 = vadd.f32 1e-08, %v909_v3  ;;  %v1050_v51 = vmul.f32 %v968_v53, %v394_v32  ;;  %v511_v54 = vmul.f32 %v509_v38, %v507_v45 }
  0x38   : > { %v1052_v52 = vmul.f32 %v466_v39, %v464_v43  ;;  %v513_v56 = vadd.f32 4.0, %v499_v28  ;;  %v512_v58 = vmul.f32 %v510_v8, %v508_v47  ;;  %v514_v59 = vadd.f32 4.0, %v1018_v30 }
  0x39   : > { %799 = vrcp.f32 %v1046_v29  ;;  %v543_v60 = vadd.f32 %v909_v3, %v313_v5  ;;  %v517_v63 = vadd.f32 5.0, %v499_v28  ;;  %v518_v11 = vadd.f32 5.0, %v1018_v30 }
  0x3a   : > { %801 = vrcp.f32 %v1052_v52  ;;  %v538_v53 = vadd.f32 1e-08, %v911_v4  ;;  %v521_v19 = vadd.f32 6.0, %v499_v28  ;;  %v522_v22 = vadd.f32 6.0, %v1018_v30 }
  0x3b   : > { %v525_v23 = vadd.f32 7.0, %v499_v28  ;;  %803 = vlog2.f32 %v537_v50  ;;  %vm474_vm0 = vweird.f32 %v1046_v29  ;;  %v478_v24 = vand.u32 2147483647, %v1046_v29 }
  0x3c   : > { %v515_v20 = vmul.f32 %v513_v56, %v511_v54  ;;  %v544_v27 = vadd.f32 %v911_v4, %v314_v57  ;;  %v480_v32 = vand.u32 2147483648, %v1046_v29  ;;  %v516_v33 = vmul.f32 %v514_v59, %v512_v58 }
  0x3d   : > { %v545_v34 = vadd.f32 1e-08, %v543_v60  ;;  %v551_v35 = vadd.f32 %v909_v3, %v315_v61  ;;  %vm489_vm1 = vweird.f32 %v1052_v52  ;;  %805 = vlog2.f32 %v538_v53 }
  0x3e   : > { %v546_v15 = vadd.f32 1e-08, %v544_v27  ;;  %v552_v28 = vadd.f32 %v911_v4, %v316_v12  ;;  %v493_v26 = vand.u32 2147483647, %v1052_v52  ;;  %v495_v36 = vand.u32 2147483648, %v1052_v52 }
  0x3f   : > { %v800_v16 = vpop.eup %799  ;;  %807 = vlog2.f32 %v545_v34  ;;  %v563_v37 = vadd.f32 1e-08, %v313_v5  ;;  %v519_v40 = vmul.f32 %v517_v63, %v515_v20  ;;  %v553_v41 = vadd.f32 1e-08, %v551_v35 }
  0x40   : > { %v802_v18 = vpop.eup %801  ;;  %v470_v39 = vmul.f32 %v800_v16, %v1046_v29  ;;  %809 = vlog2.f32 %v546_v15  ;;  %vm475_vm2 = vweird.f32 %v800_v16  ;;  %v520_v38 = vmul.f32 %v518_v11, %v516_v33 }
  0x41   : > { %v804_v31 = vpop.eup %803  ;;  %v485_v17 = vmul.f32 %v802_v18, %v1052_v52  ;;  %v564_v7 = vadd.f32 1e-08, %v314_v57  ;;  %v554_v43 = vadd.f32 1e-08, %v552_v28  ;;  %811 = vlog2.f32 %v553_v41  ;;  %vm1076_vm4 = vmor %vm474_vm0, %vm475_vm2 }
  0x42   : > { %v471_v8 = vsub.f32 1.0, %v470_v39  ;;  %v581_v45 = vadd.f32 1e-08, %v315_v61  ;;  %vm490_vm3 = vweird.f32 %v802_v18  ;;  %813 = vlog2.f32 %v563_v37 }
  0x43   : > { %v486_v47 = vsub.f32 1.0, %v485_v17  ;;  %v582_v5 = vadd.f32 1e-08, %v316_v12  ;;  %v806_v50 = vpop.eup %805  ;;  %v523_v56 = vmul.f32 %v521_v19, %v519_v40  ;;  %v526_v58 = vadd.f32 7.0, %v1018_v30  ;;  %vm1083_vm6 = vmor %vm489_vm1, %vm490_vm3 }
  0x44   : > { %v472_v54 = vmul.f32 %v800_v16, %v471_v8  ;;  %815 = vlog2.f32 %v554_v43  ;;  %v481_v60 = vor.u32 1.1754944e-38, %v480_v32  ;;  %v524_v63 = vmul.f32 %v522_v22, %v520_v38 }
  0x45   : > { %v808_v59 = vpop.eup %807  ;;  %v487_v61 = vmul.f32 %v802_v18, %v486_v47  ;;  %817 = vlog2.f32 %v564_v7  ;;  %vm479_vm5 = vcmp.eq.f32.partialorder %v478_v24, 8.507059e+37  ;;  %v496_v12 = vor.u32 1.1754944e-38, %v495_v36 }
  0x46   : > { %v810_v11 = vpop.eup %809  ;;  %v473_v53 = vadd.f32 %v800_v16, %v472_v54  ;;  %819 = vlog2.f32 %v581_v45  ;;  %vm494_vm7 = vcmp.eq.f32.partialorder %v493_v26, 8.507059e+37  ;;  %v540_v19 = vmul.f32 0.6931472, %v804_v31 }
  0x47   : > { %v488_v29 = vadd.f32 %v802_v18, %v487_v61  ;;  %821 = vlog2.f32 %v582_v5  ;;  %v812_v20 = vpop.eup %811  ;;  %v527_v27 = vmul.f32 %v525_v23, %v523_v56  ;;  %v548_v24 = vmul.f32 0.6931472, %v808_v59 }
  0x48   : > { %v477_v22 = vsel %vm1076_vm4, %v800_v16, %v473_v53  ;;  %v550_v32 = vmul.f32 0.6931472, %v810_v11  ;;  %v814_v33 = vpop.eup %813  ;;  %v528_v35 = vmul.f32 %v526_v58, %v524_v63  ;;  %v556_v15 = vmul.f32 0.6931472, %v812_v20 }
  0x49   : > { %v482_v52 = vsel %vm479_vm5, %v481_v60, %v477_v22  ;;  %v492_v34 = vsel %vm1083_vm6, %v802_v18, %v488_v29  ;;  %v542_v37 = vmul.f32 0.6931472, %v806_v50  ;;  %v566_v39 = vmul.f32 0.6931472, %v814_v33 }
  0x4a   : > { %v816_v28 = vpop.eup %815  ;;  %v483_v26 = vmul.f32 %v482_v52, %v1042_v48  ;;  %v497_v36 = vsel %vm494_vm7, %v496_v12, %v492_v34  ;;  %v407_v23 = vadd.f32 %v405_v42, %v991_v46  ;;  %v408_v16 = vadd.f32 %v406_v6, %v1050_v51 }
  0x4b   : > { %v818_v40 = vpop.eup %817  ;;  %v498_v48 = vmul.f32 %v497_v36, %v1044_v49  ;;  %v558_v18 = vmul.f32 0.6931472, %v816_v28  ;;  %v559_v17 = vsub.f32 %v540_v19, %v548_v24  ;;  %v560_v38 = vsub.f32 %v542_v37, %v550_v32 }
  0x4c   : > { %v820_v41 = vpop.eup %819  ;;  %v529_v31 = vmul.f32 %v527_v27, %v483_v26  ;;  %v568_v7 = vmul.f32 0.6931472, %v818_v40  ;;  %v569_v45 = vsub.f32 %v566_v39, %v548_v24  ;;  %v577_v47 = vsub.f32 %v540_v19, %v556_v15 }
  0x4d   : > { %v822_v8 = vpop.eup %821  ;;  %v530_v43 = vmul.f32 %v528_v35, %v498_v48  ;;  %v584_v5 = vmul.f32 0.6931472, %v820_v41  ;;  %v578_v10 = vsub.f32 %v542_v37, %v558_v18  ;;  %v409_v42 = vsub.f32 %v379_v62, %v407_v23 }
  0x4e   : > { %823 = vlog2.f32 %v529_v31  ;;  %v570_v46 = vsub.f32 %v568_v7, %v550_v32  ;;  %v586_v13 = vmul.f32 0.6931472, %v822_v8  ;;  %v621_v49 = vand.u32 2147483647, %v1105_v2 }
  0x4f   : > { %825 = vlog2.f32 %v530_v43  ;;  %v587_v6 = vsub.f32 %v584_v5, %v556_v15  ;;  %v410_v51 = vsub.f32 %v380_v21, %v408_v16  ;;  %v622_v54 = vand.u32 2147483647, %v1107_v14 }
  0x50   : > { %v588_v50 = vsub.f32 %v586_v13, %v558_v18  ;;  %v561_v56 = vmul.f32 %v559_v17, %v909_v3  ;;  %v571_v58 = vmul.f32 %v569_v45, %v902_v0  ;;  %v579_v59 = vmul.f32 %v577_v47, %v909_v3 }
  0x51   : > { %v589_v25 = vmul.f32 %v587_v6, %v902_v0  ;;  %v562_v44 = vmul.f32 %v560_v38, %v911_v4  ;;  %v572_v62 = vmul.f32 %v570_v46, %v904_v1  ;;  %v580_v57 = vmul.f32 %v578_v10, %v911_v4 }
  0x52   : > { %v590_v9 = vmul.f32 %v588_v50, %v904_v1  ;;  %v763_v55 = vadd.f32 -0.9189385, %v409_v42  ;;  %v623_v21 = vsub.f32 0.0, %v621_v49  ;;  %v764_v61 = vadd.f32 -0.9189385, %v410_v51 }
  0x53   : > { %v624_v63 = vsub.f32 0.0, %v622_v54  ;;  %v573_v30 = vadd.f32 %v571_v58, %v561_v56  ;;  %v591_v12 = vadd.f32 %v589_v25, %v579_v59  ;;  %v574_v29 = vadd.f32 %v572_v62, %v562_v44 }
  0x54   : > { %v824_v60 = vpop.eup %823  ;;  %v592_v0 = vadd.f32 %v590_v9, %v580_v57  ;;  %v625_v20 = vmul.f32 1.442695, %v623_v21  ;;  %v617_v38 = vsub.f32 0.0, %v1105_v2  ;;  %v618_v8 = vsub.f32 0.0, %v1107_v14 }
  0x55   : > { %v826_v11 = vpop.eup %825  ;;  %v532_v53 = vmul.f32 0.6931472, %v824_v60  ;;  %v627_v27 = vmul.f32 1.442695, %v624_v63 }
  0x56   : > { %v534_v3 = vmul.f32 0.6931472, %v826_v11  ;;  %827 = vpow2.f32 %v625_v20  ;;  %v619_v45 = vmax.f32 %v617_v38, 0.0  ;;  %v620_v5 = vmax.f32 %v618_v8, 0.0 }
  0x57   : > { %v535_v19 = vadd.f32 %v763_v55, %v532_v53  ;;  %829 = vpow2.f32 %v627_v27 }
  0x58   : > { %v536_v22 = vadd.f32 %v764_v61, %v534_v3 }
  0x59   : > { %v575_v24 = vadd.f32 %v573_v30, %v535_v19  ;;  %v593_v4 = vadd.f32 %v591_v12, %v535_v19 }
  0x5a   : > { %v576_v32 = vadd.f32 %v574_v29, %v536_v22  ;;  %v594_v1 = vadd.f32 %v592_v0, %v536_v22 }
  0x5b   : > { %v595_v33 = vsub.f32 %v593_v4, %v1105_v2 }
  0x5c   : > { %v596_v52 = vsub.f32 %v594_v1, %v1107_v14  ;;  %v828_v26 = vpop.eup %827 }
  0x5d   : > { %v599_v34 = vsub.f32 %v575_v24, %v595_v33  ;;  %v830_v37 = vpop.eup %829  ;;  %v629_v16 = vadd.f32 1.0, %v828_v26  ;;  %v597_v10 = vmax.f32 %v575_v24, %v595_v33 }
  0x5e   : > { %v600_v35 = vsub.f32 %v576_v32, %v596_v52  ;;  %v630_v48 = vadd.f32 1.0, %v830_v37  ;;  %v598_v42 = vmax.f32 %v576_v32, %v596_v52 }
  0x5f   : > { %v601_v15 = vand.u32 2147483647, %v599_v34 }
  0x60   : > { %v602_v28 = vand.u32 2147483647, %v600_v35 }
  0x61   : > { %v603_v36 = vsub.f32 0.0, %v601_v15 }
  0x62   : > { %v604_v39 = vsub.f32 0.0, %v602_v28 }
  0x63   : > { %v605_v40 = vmul.f32 1.442695, %v603_v36 }
  0x64   : > { %v607_v23 = vmul.f32 1.442695, %v604_v39 }
  0x65   : > { %831 = vpow2.f32 %v605_v40 }
  0x66   : > { %833 = vpow2.f32 %v607_v23 }
  0x67   : > { %835 = vlog2.f32 %v629_v16 }
  0x68   : > { %837 = vlog2.f32 %v630_v48 }
  0x6b   : > { %v832_v18 = vpop.eup %831 }
  0x6c   : > { %v834_v41 = vpop.eup %833  ;;  %v609_v31 = vadd.f32 1.0, %v832_v18 }
  0x6d   : > { %v610_v17 = vadd.f32 1.0, %v834_v41  ;;  %v836_v7 = vpop.eup %835 }
  0x6e   : > { %839 = vlog2.f32 %v609_v31  ;;  %v838_v43 = vpop.eup %837  ;;  %v632_v47 = vmul.f32 0.6931472, %v836_v7 }
  0x6f   : > { %841 = vlog2.f32 %v610_v17  ;;  %v634_v46 = vmul.f32 0.6931472, %v838_v43 }
  0x70   : > { %v635_v51 = vadd.f32 %v632_v47, %v619_v45 }
  0x71   : > { %v636_v2 = vadd.f32 %v634_v46, %v620_v5 }
  0x74   : > { %v840_v13 = vpop.eup %839 }
  0x75   : > { %v842_v6 = vpop.eup %841  ;;  %v612_v49 = vmul.f32 0.6931472, %v840_v13 }
  0x76   : > { %v614_v50 = vmul.f32 0.6931472, %v842_v6 }
  0x77   : > { %v615_v54 = vadd.f32 %v612_v49, %v597_v10 }
  0x78   : > { %v616_v56 = vadd.f32 %v614_v50, %v598_v42 }
  0x79   : > { %v637_v58 = vsub.f32 %v635_v51, %v615_v54 }
  0x7a   : > { %v638_v14 = vsub.f32 %v636_v2, %v616_v56 }
  0x7c   : > { %v639_v59 = vadd.f32 %v638_v14, %v637_v58 }
  0x7e   : > { %v640_v25 = vrot.slane %v639_v59, 4 }
  0x80   : > { %v641_v44 = vadd.f32 %v640_v25, %v639_v59 }
  0x82   : > { %v642_v62 = vrot.slane %v641_v44, 2 }
  0x84   : > { %v643_v57 = vadd.f32 %v642_v62, %v641_v44 }
  0x86   : > { %v644_v9 = vrot.slane %v643_v57, 1 }
  0x88   : > { %v645_v55 = vadd.f32 %v644_v9, %v643_v57 }
  0x8a   : > { %646 = vst [vmem:[%s310_s14] sm:$0x1] %v645_v55 }
  0x8b PF: > { %s15_s18 = sadd.s32 1, %s849_s18  }
  0x8c   : > { %p12_p5 = scmp.ge.s32.totalorder %s15_s18, 4  }
  0x8e   :  { %14 = sbr.rel (!%p12_p5) target bundleno = 1 (0x1), region = 82 }

</bundles_post_ra>
